<compile_context>
chip_gen: v7x
topology: tpu7x:2x2x1
jax: 0.10.0
libtpu: 0.0.40
codegen_flags: <defaults>
</compile_context>

<pallas_src>
import math

import jax
import jax.numpy as jnp
from jax.experimental import pallas as pl
from jax.experimental.pallas import tpu as pltpu


# ---------------------------------------------------------------------------
# Fused kernel: conv1..conv6 + channel-major flatten + fcl for ONE batch
# element per grid step.  All weights stay VMEM-resident across the grid
# (constant-index BlockSpecs); the only HBM write is the (1, 6) logits row.
# ---------------------------------------------------------------------------
def _fused_classification_kernel(
        xg_ref,
        w1_ref, b1_ref, w2_ref, b2_ref, w3_ref, b3_ref,
        w4_ref, b4_ref, w5_ref, b5_ref, w6_ref, b6_ref,
        wfc_ref, bfc_ref, o_ref):
    f32 = jnp.float32
    h = xg_ref[0]                                   # (G, 8*Cin), compute dtype

    def strided_conv(h, w_ref, b_ref):
        # Stride-2 / k=3 / pad=1 conv as ONE matmul on position-grouped rows.
        # The single cross-row dependency (left-neighbour tap of the first
        # output position of each group) is supplied by appending the
        # previous row's last input position as extra columns; row 0 gets the
        # zero left padding.  This replaces the old dense (R,R) shift matmul
        # with a sublane shift + lane concat and keeps the layer as a single
        # MXU op (no separate P matmul).
        cin = w_ref.shape[0] - h.shape[1]
        x_last = h[:, -cin:]                                        # (G, cin)
        x_prev = jnp.concatenate(
            [jnp.zeros_like(x_last[:1]), x_last[:-1]], axis=0)      # (G, cin)
        h_ext = jnp.concatenate([h, x_prev], axis=1)                # (G, (2g+1)cin)
        y = jnp.dot(h_ext, w_ref[...], preferred_element_type=f32) + b_ref[...]
        return jnp.maximum(y, 0.0).astype(h.dtype)

    def pointwise_conv(h, w_ref, b_ref):
        y = jnp.dot(h, w_ref[...], preferred_element_type=f32) + b_ref[...]
        return jnp.maximum(y, 0.0).astype(h.dtype)

    h = strided_conv(h, w1_ref, b1_ref)             # (G, 4*C)   conv1 + ReLU
    h = strided_conv(h, w2_ref, b2_ref)             # (G, 2*C)   conv2 + ReLU
    h = strided_conv(h, w3_ref, b3_ref)             # (G,   C)   conv3 + ReLU
    h = pointwise_conv(h, w4_ref, b4_ref)           # (G, C/2)   conv4 + ReLU
    h = pointwise_conv(h, w5_ref, b5_ref)           # (G, C/4)   conv5 + ReLU
    h6 = jnp.maximum(                               # (G, C/16)  conv6 + ReLU (f32)
        jnp.dot(h, w6_ref[...], preferred_element_type=f32) + b6_ref[...], 0.0)

    # FC with torch's channel-major flatten folded into wfc (shape (C6, G, 6)):
    # pure VPU multiply + reduce -- no tiny serial MXU dots, no batch_sel dot.
    out = bfc_ref[...]                              # (1, 6) f32
    for c in range(h6.shape[1]):                    # static, C/16 iterations
        out = out + jnp.sum(h6[:, c:c + 1] * wfc_ref[c], axis=0, keepdims=True)
    o_ref[0] = out


# ---------------------------------------------------------------------------
# One-time weight restructuring (hoisted out of the forward path)
# ---------------------------------------------------------------------------
def _strided_conv_as_matmul(w, b, g):
    """Stride-2/k3/pad1 Conv1d -> a single grouped-matmul weight.

    Input rows hold 2g consecutive positions (position-major, channel-minor)
    plus, as trailing columns, the previous row's last position.  Returns
    (W_ext, bias_row) with W_ext of shape ((2g+1)*cin, g*cout) such that
        y_row = relu(h_ext_row @ W_ext + bias_row).
    """
    cout, cin, _ = w.shape
    taps = [jnp.transpose(w[:, :, k]) for k in range(3)]       # (cin, cout)
    zero = jnp.zeros((cin, cout), w.dtype)
    cols = []
    for t in range(g):                    # output position within group
        blocks = []
        for p in range(2 * g):            # in-group input position
            if p == 2 * t - 1:
                blocks.append(taps[0])
            elif p == 2 * t:
                blocks.append(taps[1])
            elif p == 2 * t + 1:
                blocks.append(taps[2])
            else:
                blocks.append(zero)
        # previous row's last input position feeds only output position 0
        blocks.append(taps[0] if t == 0 else zero)
        cols.append(jnp.concatenate(blocks, axis=0))
    w_ext = jnp.concatenate(cols, axis=1)            # ((2g+1)*cin, g*cout)
    bias = jnp.tile(b, g).reshape(1, g * cout)
    return w_ext, bias


def prepare_params(p, compute_dtype=jnp.bfloat16):
    """Restructure PyTorch-layout params ONCE.  Matmul weights in compute
    dtype (bf16 by default: native MXU path), biases / FC weight in f32."""
    cd = compute_dtype
    f32 = jnp.float32
    w1, b1 = _strided_conv_as_matmul(p["w1"], p["b1"], 4)
    w2, b2 = _strided_conv_as_matmul(p["w2"], p["b2"], 2)
    w3, b3 = _strided_conv_as_matmul(p["w3"], p["b3"], 1)
    n_out, fc_in = p["wfc"].shape
    c6 = p["w6"].shape[0]
    g = fc_in // c6
    # torch.flatten of (B, C6, G) is channel-major (col = c*G + l); fold that
    # permutation into wfc arranged as (C6, G, n_out).
    wfc = jnp.transpose(p["wfc"].reshape(n_out, c6, g), (1, 2, 0))
    return {
        "w1": w1.astype(cd), "b1": b1.astype(f32),
        "w2": w2.astype(cd), "b2": b2.astype(f32),
        "w3": w3.astype(cd), "b3": b3.astype(f32),
        "w4": jnp.transpose(p["w4"][:, :, 0]).astype(cd),
        "b4": p["b4"].reshape(1, -1).astype(f32),
        "w5": jnp.transpose(p["w5"][:, :, 0]).astype(cd),
        "b5": p["b5"].reshape(1, -1).astype(f32),
        "w6": jnp.transpose(p["w6"][:, :, 0]).astype(cd),
        "b6": p["b6"].reshape(1, -1).astype(f32),
        "wfc": wfc.astype(f32),
        "bfc": p["bfc"].reshape(1, -1).astype(f32),
    }


# ---------------------------------------------------------------------------
# Forward wrappers
# ---------------------------------------------------------------------------
def forward_channels_last(x_blc, prep):
    """x_blc: (B, L, channels_in) channels-last activations."""
    B, L, Cin = x_blc.shape
    assert L % 8 == 0, "stride-2 conv stack assumes L divisible by 8"
    G = L // 8
    n_out = prep["bfc"].shape[1]
    xg = x_blc.reshape(B, G, 8 * Cin).astype(prep["w1"].dtype)   # free reshape

    weights = (prep["w1"], prep["b1"], prep["w2"], prep["b2"],
               prep["w3"], prep["b3"], prep["w4"], prep["b4"],
               prep["w5"], prep["b5"], prep["w6"], prep["b6"],
               prep["wfc"], prep["bfc"])

    def resident(a):          # whole array, stays VMEM-resident across grid
        nd = a.ndim
        return pl.BlockSpec(a.shape, lambda b, nd=nd: (0,) * nd)

    out = pl.pallas_call(
        _fused_classification_kernel,
        out_shape=jax.ShapeDtypeStruct((B, 1, n_out), jnp.float32),
        grid=(B,),
        in_specs=[pl.BlockSpec((1, G, 8 * Cin), lambda b: (b, 0, 0))]
                 + [resident(a) for a in weights],
        out_specs=pl.BlockSpec((1, 1, n_out), lambda b: (b, 0, 0)),
        compiler_params=pltpu.CompilerParams(
            dimension_semantics=("parallel",),      # megacore / v7x 2 TCs
            vmem_limit_bytes=32 * 1024 * 1024),
    )(xg, *weights)
    return out.reshape(B, n_out)


def classification_forward(x_bcl, prep):
    """PyTorch-layout entry point: x_bcl is (B, channels_in, L)."""
    # NOTE: production callers should feed channels-last activations so this
    # transpose (a full HBM round trip before the kernel) disappears upstream.
    return forward_channels_last(jnp.transpose(x_bcl, (0, 2, 1)), prep)


# ---------------------------------------------------------------------------
# Deterministic parameter init (matches PyTorch default init scheme)
# ---------------------------------------------------------------------------
def init_params(key, channels_in, out_features):
    c = channels_in
    conv_shapes = [
        (c, c, 3), (c, c, 3), (c, c, 3),
        (c // 2, c, 1), (c // 4, c // 2, 1), (c // 16, c // 4, 1),
    ]
    params = {}
    for i, (co, ci, k) in enumerate(conv_shapes, start=1):
        key, kw, kb = jax.random.split(key, 3)
        bound = 1.0 / math.sqrt(ci * k)
        params[f"w{i}"] = jax.random.uniform(kw, (co, ci, k), jnp.float32,
                                             -bound, bound)
        params[f"b{i}"] = jax.random.uniform(kb, (co,), jnp.float32,
                                             -bound, bound)
    fc_in = out_features * (c // 16)
    key, kw, kb = jax.random.split(key, 3)
    bound = 1.0 / math.sqrt(fc_in)
    params["wfc"] = jax.random.uniform(kw, (6, fc_in), jnp.float32, -bound, bound)
    params["bfc"] = jax.random.uniform(kb, (6,), jnp.float32, -bound, bound)
    return params


# ---------------------------------------------------------------------------
# Pure-JAX reference (for correctness check)
# ---------------------------------------------------------------------------
def _ref_conv1d(x, w, b, stride, pad):
    y = jax.lax.conv_general_dilated(
        x, w, window_strides=(stride,), padding=[(pad, pad)],
        dimension_numbers=("NCH", "OIH", "NCH"))
    return y + b[None, :, None]


def reference_forward(x, p):
    out = jax.nn.relu(_ref_conv1d(x, p["w1"], p["b1"], 2, 1))
    out = jax.nn.relu(_ref_conv1d(out, p["w2"], p["b2"], 2, 1))
    out = jax.nn.relu(_ref_conv1d(out, p["w3"], p["b3"], 2, 1))
    out = jax.nn.relu(_ref_conv1d(out, p["w4"], p["b4"], 1, 0))
    out = jax.nn.relu(_ref_conv1d(out, p["w5"], p["b5"], 1, 0))
    out = jax.nn.relu(_ref_conv1d(out, p["w6"], p["b6"], 1, 0))
    flat = out.reshape(out.shape[0], -1)
    return flat @ p["wfc"].T + p["bfc"]


# ---------------------------------------------------------------------------
if __name__ == "__main__":
    # Small, consistent shapes: channels_in=32, L=40.
    # 40 -s2-> 20 -s2-> 10 -s2-> 5, so out_features=5,
    # conv6 channels = 32//16 = 2, fcl in_features = 5*2 = 10.
    B, CIN, L = 2, 32, 40
    OUT_FEATURES = L // 8          # 5

    key = jax.random.PRNGKey(0)
    key, kx = jax.random.split(key)
    x = jax.random.normal(kx, (B, CIN, L), dtype=jnp.float32)
    params = init_params(key, CIN, OUT_FEATURES)

    ref = jax.block_until_ready(reference_forward(x, params))
    fwd = jax.jit(classification_forward)

    # f32 compute path: tight check of the restructured-weight algebra.
    prep_f32 = prepare_params(params, compute_dtype=jnp.float32)
    out_f32 = jax.block_until_ready(fwd(x, prep_f32))
    assert out_f32.shape == (B, 6), out_f32.shape
    assert jnp.allclose(out_f32, ref, atol=2e-4, rtol=2e-4), (
        float(jnp.max(jnp.abs(out_f32 - ref))))

    # bf16 operand path (production default): native MXU throughput, f32 acc.
    prep_bf16 = prepare_params(params, compute_dtype=jnp.bfloat16)
    out_bf16 = jax.block_until_ready(fwd(x, prep_bf16))
    assert out_bf16.shape == (B, 6), out_bf16.shape
    assert jnp.allclose(out_bf16, ref, atol=5e-2, rtol=5e-2), (
        float(jnp.max(jnp.abs(out_bf16 - ref))))

    print("KERNEL_OK")
</pallas_src>

<mosaic_0001>
module attributes {stable_mosaic.version = 11 : i64} {
  func.func @_fused_classification_kernel(%arg0: i32, %arg1: memref<1x5x256xf32, #tpu.memory_space<vmem>>, %arg2: memref<288x128xf32, #tpu.memory_space<vmem>>, %arg3: memref<1x128xf32, #tpu.memory_space<vmem>>, %arg4: memref<160x64xf32, #tpu.memory_space<vmem>>, %arg5: memref<1x64xf32, #tpu.memory_space<vmem>>, %arg6: memref<96x32xf32, #tpu.memory_space<vmem>>, %arg7: memref<1x32xf32, #tpu.memory_space<vmem>>, %arg8: memref<32x16xf32, #tpu.memory_space<vmem>>, %arg9: memref<1x16xf32, #tpu.memory_space<vmem>>, %arg10: memref<16x8xf32, #tpu.memory_space<vmem>>, %arg11: memref<1x8xf32, #tpu.memory_space<vmem>>, %arg12: memref<8x2xf32, #tpu.memory_space<vmem>>, %arg13: memref<1x2xf32, #tpu.memory_space<vmem>>, %arg14: memref<2x5x6xf32, #tpu.memory_space<vmem>>, %arg15: memref<1x6xf32, #tpu.memory_space<vmem>>, %arg16: memref<1x1x6xf32, #tpu.memory_space<vmem>>) attributes {dimension_semantics = [#tpu.dimension_semantics<parallel>], iteration_bounds = array<i64: 2>, scalar_prefetch = 0 : i64, scratch_operands = 0 : i64, tpu.core_type = #tpu.core_type<tc>, window_params = [{transform_indices = @transform_0, window_bounds = array<i64: 1, 5, 256>}, {pipeline_mode = #tpu.pipeline_mode<synchronous>, transform_indices = @transform_1, window_bounds = array<i64: 288, 128>}, {pipeline_mode = #tpu.pipeline_mode<synchronous>, transform_indices = @transform_2, window_bounds = array<i64: 1, 128>}, {pipeline_mode = #tpu.pipeline_mode<synchronous>, transform_indices = @transform_3, window_bounds = array<i64: 160, 64>}, {pipeline_mode = #tpu.pipeline_mode<synchronous>, transform_indices = @transform_4, window_bounds = array<i64: 1, 64>}, {pipeline_mode = #tpu.pipeline_mode<synchronous>, transform_indices = @transform_5, window_bounds = array<i64: 96, 32>}, {pipeline_mode = #tpu.pipeline_mode<synchronous>, transform_indices = @transform_6, window_bounds = array<i64: 1, 32>}, {pipeline_mode = #tpu.pipeline_mode<synchronous>, transform_indices = @transform_7, window_bounds = array<i64: 32, 16>}, {pipeline_mode = #tpu.pipeline_mode<synchronous>, transform_indices = @transform_8, window_bounds = array<i64: 1, 16>}, {pipeline_mode = #tpu.pipeline_mode<synchronous>, transform_indices = @transform_9, window_bounds = array<i64: 16, 8>}, {pipeline_mode = #tpu.pipeline_mode<synchronous>, transform_indices = @transform_10, window_bounds = array<i64: 1, 8>}, {pipeline_mode = #tpu.pipeline_mode<synchronous>, transform_indices = @transform_11, window_bounds = array<i64: 8, 2>}, {pipeline_mode = #tpu.pipeline_mode<synchronous>, transform_indices = @transform_12, window_bounds = array<i64: 1, 2>}, {pipeline_mode = #tpu.pipeline_mode<synchronous>, transform_indices = @transform_13, window_bounds = array<i64: 2, 5, 6>}, {pipeline_mode = #tpu.pipeline_mode<synchronous>, transform_indices = @transform_14, window_bounds = array<i64: 1, 6>}, {transform_indices = @transform_15, window_bounds = array<i64: 1, 1, 6>}]} {
    %c0 = arith.constant 0 : index
    %c0_0 = arith.constant 0 : index
    %c0_1 = arith.constant 0 : index
    %0 = vector.load %arg1[%c0, %c0_0, %c0_1] : memref<1x5x256xf32, #tpu.memory_space<vmem>>, vector<1x5x256xf32>
    %1 = vector.shape_cast %0 : vector<1x5x256xf32> to vector<5x256xf32>
    %2 = vector.extract_strided_slice %1 {offsets = [0, 224], sizes = [5, 32], strides = [1, 1]} : vector<5x256xf32> to vector<5x32xf32>
    %cst = arith.constant 0.000000e+00 : f32
    %3 = vector.broadcast %cst : f32 to vector<1x32xf32>
    %4 = vector.extract_strided_slice %2 {offsets = [0, 0], sizes = [4, 32], strides = [1, 1]} : vector<5x32xf32> to vector<4x32xf32>
    %5 = tpu.concatenate %3, %4 in 0 : vector<1x32xf32>, vector<4x32xf32> -> vector<5x32xf32>
    %6 = tpu.concatenate %1, %5 in 1 : vector<5x256xf32>, vector<5x32xf32> -> vector<5x288xf32>
    %c0_2 = arith.constant 0 : index
    %c0_3 = arith.constant 0 : index
    %7 = vector.load %arg2[%c0_2, %c0_3] : memref<288x128xf32, #tpu.memory_space<vmem>>, vector<288x128xf32>
    %cst_4 = arith.constant dense<0.000000e+00> : vector<5x128xf32>
    %8 = tpu.matmul %6, %7, %cst_4 {dimension_numbers = #tpu.dot_dimension_numbers<[1], [0], [0], [1], [0, 0, 1, 1], [], []>} : vector<5x288xf32>, vector<288x128xf32>, vector<5x128xf32> -> vector<5x128xf32>
    %c0_5 = arith.constant 0 : index
    %c0_6 = arith.constant 0 : index
    %9 = vector.load %arg3[%c0_5, %c0_6] : memref<1x128xf32, #tpu.memory_space<vmem>>, vector<1x128xf32>
    %10 = vector.broadcast %9 : vector<1x128xf32> to vector<5x128xf32>
    %11 = arith.addf %8, %10 : vector<5x128xf32>
    %cst_7 = arith.constant 0.000000e+00 : f32
    %12 = vector.broadcast %cst_7 : f32 to vector<5x128xf32>
    %13 = arith.maximumf %11, %12 : vector<5x128xf32>
    %14 = vector.extract_strided_slice %13 {offsets = [0, 96], sizes = [5, 32], strides = [1, 1]} : vector<5x128xf32> to vector<5x32xf32>
    %cst_8 = arith.constant 0.000000e+00 : f32
    %15 = vector.broadcast %cst_8 : f32 to vector<1x32xf32>
    %16 = vector.extract_strided_slice %14 {offsets = [0, 0], sizes = [4, 32], strides = [1, 1]} : vector<5x32xf32> to vector<4x32xf32>
    %17 = tpu.concatenate %15, %16 in 0 : vector<1x32xf32>, vector<4x32xf32> -> vector<5x32xf32>
    %18 = tpu.concatenate %13, %17 in 1 : vector<5x128xf32>, vector<5x32xf32> -> vector<5x160xf32>
    %c0_9 = arith.constant 0 : index
    %c0_10 = arith.constant 0 : index
    %19 = vector.load %arg4[%c0_9, %c0_10] : memref<160x64xf32, #tpu.memory_space<vmem>>, vector<160x64xf32>
    %cst_11 = arith.constant dense<0.000000e+00> : vector<5x64xf32>
    %20 = tpu.matmul %18, %19, %cst_11 {dimension_numbers = #tpu.dot_dimension_numbers<[1], [0], [0], [1], [0, 0, 1, 1], [], []>} : vector<5x160xf32>, vector<160x64xf32>, vector<5x64xf32> -> vector<5x64xf32>
    %c0_12 = arith.constant 0 : index
    %c0_13 = arith.constant 0 : index
    %21 = vector.load %arg5[%c0_12, %c0_13] : memref<1x64xf32, #tpu.memory_space<vmem>>, vector<1x64xf32>
    %22 = vector.broadcast %21 : vector<1x64xf32> to vector<5x64xf32>
    %23 = arith.addf %20, %22 : vector<5x64xf32>
    %cst_14 = arith.constant 0.000000e+00 : f32
    %24 = vector.broadcast %cst_14 : f32 to vector<5x64xf32>
    %25 = arith.maximumf %23, %24 : vector<5x64xf32>
    %26 = vector.extract_strided_slice %25 {offsets = [0, 32], sizes = [5, 32], strides = [1, 1]} : vector<5x64xf32> to vector<5x32xf32>
    %cst_15 = arith.constant 0.000000e+00 : f32
    %27 = vector.broadcast %cst_15 : f32 to vector<1x32xf32>
    %28 = vector.extract_strided_slice %26 {offsets = [0, 0], sizes = [4, 32], strides = [1, 1]} : vector<5x32xf32> to vector<4x32xf32>
    %29 = tpu.concatenate %27, %28 in 0 : vector<1x32xf32>, vector<4x32xf32> -> vector<5x32xf32>
    %30 = tpu.concatenate %25, %29 in 1 : vector<5x64xf32>, vector<5x32xf32> -> vector<5x96xf32>
    %c0_16 = arith.constant 0 : index
    %c0_17 = arith.constant 0 : index
    %31 = vector.load %arg6[%c0_16, %c0_17] : memref<96x32xf32, #tpu.memory_space<vmem>>, vector<96x32xf32>
    %cst_18 = arith.constant dense<0.000000e+00> : vector<5x32xf32>
    %32 = tpu.matmul %30, %31, %cst_18 {dimension_numbers = #tpu.dot_dimension_numbers<[1], [0], [0], [1], [0, 0, 1, 1], [], []>} : vector<5x96xf32>, vector<96x32xf32>, vector<5x32xf32> -> vector<5x32xf32>
    %c0_19 = arith.constant 0 : index
    %c0_20 = arith.constant 0 : index
    %33 = vector.load %arg7[%c0_19, %c0_20] : memref<1x32xf32, #tpu.memory_space<vmem>>, vector<1x32xf32>
    %34 = vector.broadcast %33 : vector<1x32xf32> to vector<5x32xf32>
    %35 = arith.addf %32, %34 : vector<5x32xf32>
    %cst_21 = arith.constant 0.000000e+00 : f32
    %36 = vector.broadcast %cst_21 : f32 to vector<5x32xf32>
    %37 = arith.maximumf %35, %36 : vector<5x32xf32>
    %c0_22 = arith.constant 0 : index
    %c0_23 = arith.constant 0 : index
    %38 = vector.load %arg8[%c0_22, %c0_23] : memref<32x16xf32, #tpu.memory_space<vmem>>, vector<32x16xf32>
    %cst_24 = arith.constant dense<0.000000e+00> : vector<5x16xf32>
    %39 = tpu.matmul %37, %38, %cst_24 {dimension_numbers = #tpu.dot_dimension_numbers<[1], [0], [0], [1], [0, 0, 1, 1], [], []>} : vector<5x32xf32>, vector<32x16xf32>, vector<5x16xf32> -> vector<5x16xf32>
    %c0_25 = arith.constant 0 : index
    %c0_26 = arith.constant 0 : index
    %40 = vector.load %arg9[%c0_25, %c0_26] : memref<1x16xf32, #tpu.memory_space<vmem>>, vector<1x16xf32>
    %41 = vector.broadcast %40 : vector<1x16xf32> to vector<5x16xf32>
    %42 = arith.addf %39, %41 : vector<5x16xf32>
    %cst_27 = arith.constant 0.000000e+00 : f32
    %43 = vector.broadcast %cst_27 : f32 to vector<5x16xf32>
    %44 = arith.maximumf %42, %43 : vector<5x16xf32>
    %c0_28 = arith.constant 0 : index
    %c0_29 = arith.constant 0 : index
    %45 = vector.load %arg10[%c0_28, %c0_29] : memref<16x8xf32, #tpu.memory_space<vmem>>, vector<16x8xf32>
    %cst_30 = arith.constant dense<0.000000e+00> : vector<5x8xf32>
    %46 = tpu.matmul %44, %45, %cst_30 {dimension_numbers = #tpu.dot_dimension_numbers<[1], [0], [0], [1], [0, 0, 1, 1], [], []>} : vector<5x16xf32>, vector<16x8xf32>, vector<5x8xf32> -> vector<5x8xf32>
    %c0_31 = arith.constant 0 : index
    %c0_32 = arith.constant 0 : index
    %47 = vector.load %arg11[%c0_31, %c0_32] : memref<1x8xf32, #tpu.memory_space<vmem>>, vector<1x8xf32>
    %48 = vector.broadcast %47 : vector<1x8xf32> to vector<5x8xf32>
    %49 = arith.addf %46, %48 : vector<5x8xf32>
    %cst_33 = arith.constant 0.000000e+00 : f32
    %50 = vector.broadcast %cst_33 : f32 to vector<5x8xf32>
    %51 = arith.maximumf %49, %50 : vector<5x8xf32>
    %c0_34 = arith.constant 0 : index
    %c0_35 = arith.constant 0 : index
    %52 = vector.load %arg12[%c0_34, %c0_35] : memref<8x2xf32, #tpu.memory_space<vmem>>, vector<8x2xf32>
    %cst_36 = arith.constant dense<0.000000e+00> : vector<5x2xf32>
    %53 = tpu.matmul %51, %52, %cst_36 {dimension_numbers = #tpu.dot_dimension_numbers<[1], [0], [0], [1], [0, 0, 1, 1], [], []>} : vector<5x8xf32>, vector<8x2xf32>, vector<5x2xf32> -> vector<5x2xf32>
    %c0_37 = arith.constant 0 : index
    %c0_38 = arith.constant 0 : index
    %54 = vector.load %arg13[%c0_37, %c0_38] : memref<1x2xf32, #tpu.memory_space<vmem>>, vector<1x2xf32>
    %55 = vector.broadcast %54 : vector<1x2xf32> to vector<5x2xf32>
    %56 = arith.addf %53, %55 : vector<5x2xf32>
    %cst_39 = arith.constant 0.000000e+00 : f32
    %57 = vector.broadcast %cst_39 : f32 to vector<5x2xf32>
    %58 = arith.maximumf %56, %57 : vector<5x2xf32>
    %c0_40 = arith.constant 0 : index
    %c0_41 = arith.constant 0 : index
    %59 = vector.load %arg15[%c0_40, %c0_41] : memref<1x6xf32, #tpu.memory_space<vmem>>, vector<1x6xf32>
    %60 = vector.extract_strided_slice %58 {offsets = [0, 0], sizes = [5, 1], strides = [1, 1]} : vector<5x2xf32> to vector<5x1xf32>
    %c0_42 = arith.constant 0 : index
    %c0_43 = arith.constant 0 : index
    %c0_44 = arith.constant 0 : index
    %61 = vector.load %arg14[%c0_42, %c0_43, %c0_44] : memref<2x5x6xf32, #tpu.memory_space<vmem>>, vector<1x5x6xf32>
    %62 = vector.shape_cast %61 : vector<1x5x6xf32> to vector<5x6xf32>
    %63 = vector.broadcast %60 : vector<5x1xf32> to vector<5x6xf32>
    %64 = arith.mulf %63, %62 : vector<5x6xf32>
    %cst_45 = arith.constant dense<0.000000e+00> : vector<6xf32>
    %65 = vector.multi_reduction <add>, %64, %cst_45 [0] : vector<5x6xf32> to vector<6xf32>
    %66 = vector.shape_cast %65 : vector<6xf32> to vector<1x6xf32>
    %67 = arith.addf %59, %66 : vector<1x6xf32>
    %68 = vector.extract_strided_slice %58 {offsets = [0, 1], sizes = [5, 1], strides = [1, 1]} : vector<5x2xf32> to vector<5x1xf32>
    %c1 = arith.constant 1 : index
    %c0_46 = arith.constant 0 : index
    %c0_47 = arith.constant 0 : index
    %69 = vector.load %arg14[%c1, %c0_46, %c0_47] : memref<2x5x6xf32, #tpu.memory_space<vmem>>, vector<1x5x6xf32>
    %70 = vector.shape_cast %69 : vector<1x5x6xf32> to vector<5x6xf32>
    %71 = vector.broadcast %68 : vector<5x1xf32> to vector<5x6xf32>
    %72 = arith.mulf %71, %70 : vector<5x6xf32>
    %cst_48 = arith.constant dense<0.000000e+00> : vector<6xf32>
    %73 = vector.multi_reduction <add>, %72, %cst_48 [0] : vector<5x6xf32> to vector<6xf32>
    %74 = vector.shape_cast %73 : vector<6xf32> to vector<1x6xf32>
    %75 = arith.addf %67, %74 : vector<1x6xf32>
    %c0_49 = arith.constant 0 : index
    %c0_50 = arith.constant 0 : index
    %c0_51 = arith.constant 0 : index
    %76 = vector.load %arg16[%c0_49, %c0_50, %c0_51] : memref<1x1x6xf32, #tpu.memory_space<vmem>>, vector<1x1x6xf32>
    %77 = vector.shape_cast %76 : vector<1x1x6xf32> to vector<1x6xf32>
    %78 = vector.shape_cast %75 : vector<1x6xf32> to vector<1x1x6xf32>
    tpu.vector_store %arg16[%c0_49, %c0_50, %c0_51], %78 {strides = array<i32>} : memref<1x1x6xf32, #tpu.memory_space<vmem>>, vector<1x1x6xf32>,
    return
  }
  func.func @transform_0(%arg0: i32) -> (i32, i32, i32) {
    %c0_i32 = arith.constant 0 : i32
    %c0_i32_0 = arith.constant 0 : i32
    %c0_i32_1 = arith.constant 0 : i32
    return %arg0, %c0_i32, %c0_i32_0 : i32, i32, i32
  }
  func.func @transform_1(%arg0: i32) -> (i32, i32) {
    %c0_i32 = arith.constant 0 : i32
    %c0_i32_0 = arith.constant 0 : i32
    %c0_i32_1 = arith.constant 0 : i32
    return %c0_i32, %c0_i32_0 : i32, i32
  }
  func.func @transform_2(%arg0: i32) -> (i32, i32) {
    %c0_i32 = arith.constant 0 : i32
    %c0_i32_0 = arith.constant 0 : i32
    %c0_i32_1 = arith.constant 0 : i32
    return %c0_i32, %c0_i32_0 : i32, i32
  }
  func.func @transform_3(%arg0: i32) -> (i32, i32) {
    %c0_i32 = arith.constant 0 : i32
    %c0_i32_0 = arith.constant 0 : i32
    %c0_i32_1 = arith.constant 0 : i32
    return %c0_i32, %c0_i32_0 : i32, i32
  }
  func.func @transform_4(%arg0: i32) -> (i32, i32) {
    %c0_i32 = arith.constant 0 : i32
    %c0_i32_0 = arith.constant 0 : i32
    %c0_i32_1 = arith.constant 0 : i32
    return %c0_i32, %c0_i32_0 : i32, i32
  }
  func.func @transform_5(%arg0: i32) -> (i32, i32) {
    %c0_i32 = arith.constant 0 : i32
    %c0_i32_0 = arith.constant 0 : i32
    %c0_i32_1 = arith.constant 0 : i32
    return %c0_i32, %c0_i32_0 : i32, i32
  }
  func.func @transform_6(%arg0: i32) -> (i32, i32) {
    %c0_i32 = arith.constant 0 : i32
    %c0_i32_0 = arith.constant 0 : i32
    %c0_i32_1 = arith.constant 0 : i32
    return %c0_i32, %c0_i32_0 : i32, i32
  }
  func.func @transform_7(%arg0: i32) -> (i32, i32) {
    %c0_i32 = arith.constant 0 : i32
    %c0_i32_0 = arith.constant 0 : i32
    %c0_i32_1 = arith.constant 0 : i32
    return %c0_i32, %c0_i32_0 : i32, i32
  }
  func.func @transform_8(%arg0: i32) -> (i32, i32) {
    %c0_i32 = arith.constant 0 : i32
    %c0_i32_0 = arith.constant 0 : i32
    %c0_i32_1 = arith.constant 0 : i32
    return %c0_i32, %c0_i32_0 : i32, i32
  }
  func.func @transform_9(%arg0: i32) -> (i32, i32) {
    %c0_i32 = arith.constant 0 : i32
    %c0_i32_0 = arith.constant 0 : i32
    %c0_i32_1 = arith.constant 0 : i32
    return %c0_i32, %c0_i32_0 : i32, i32
  }
  func.func @transform_10(%arg0: i32) -> (i32, i32) {
    %c0_i32 = arith.constant 0 : i32
    %c0_i32_0 = arith.constant 0 : i32
    %c0_i32_1 = arith.constant 0 : i32
    return %c0_i32, %c0_i32_0 : i32, i32
  }
  func.func @transform_11(%arg0: i32) -> (i32, i32) {
    %c0_i32 = arith.constant 0 : i32
    %c0_i32_0 = arith.constant 0 : i32
    %c0_i32_1 = arith.constant 0 : i32
    return %c0_i32, %c0_i32_0 : i32, i32
  }
  func.func @transform_12(%arg0: i32) -> (i32, i32) {
    %c0_i32 = arith.constant 0 : i32
    %c0_i32_0 = arith.constant 0 : i32
    %c0_i32_1 = arith.constant 0 : i32
    return %c0_i32, %c0_i32_0 : i32, i32
  }
  func.func @transform_13(%arg0: i32) -> (i32, i32, i32) {
    %c0_i32 = arith.constant 0 : i32
    %c0_i32_0 = arith.constant 0 : i32
    %c0_i32_1 = arith.constant 0 : i32
    %c0_i32_2 = arith.constant 0 : i32
    return %c0_i32, %c0_i32_0, %c0_i32_1 : i32, i32, i32
  }
  func.func @transform_14(%arg0: i32) -> (i32, i32) {
    %c0_i32 = arith.constant 0 : i32
    %c0_i32_0 = arith.constant 0 : i32
    %c0_i32_1 = arith.constant 0 : i32
    return %c0_i32, %c0_i32_0 : i32, i32
  }
  func.func @transform_15(%arg0: i32) -> (i32, i32, i32) {
    %c0_i32 = arith.constant 0 : i32
    %c0_i32_0 = arith.constant 0 : i32
    %c0_i32_1 = arith.constant 0 : i32
    return %arg0, %c0_i32, %c0_i32_0 : i32, i32, i32
  }
}

</mosaic_0001>

<bundles_post_ra>
// kernel: classification_forward.1
= control target key start
LH: loop header
LB: loop body
LE: loop exit
PB: predicated region body
PF: predicated region fallthrough
CT: control target
= control target key end

     0   :  { %s2097_s0 = inlined_call_operand.vmem [shape: f32[2,5,256], index: 0, kind: input, shape index: {}]   ;;  %s2098_s1 = inlined_call_operand.vmem [shape: f32[288,128], index: 1, kind: input, shape index: {}]   ;;  %s2099_s2 = inlined_call_operand.vmem [shape: f32[1,128], index: 2, kind: input, shape index: {}]   ;;  %s2100_s3 = inlined_call_operand.vmem [shape: f32[160,64], index: 3, kind: input, shape index: {}]   ;;  %s2101_s4 = inlined_call_operand.vmem [shape: f32[1,64], index: 4, kind: input, shape index: {}]   ;;  %s2102_s5 = inlined_call_operand.vmem [shape: f32[96,32], index: 5, kind: input, shape index: {}]   ;;  %s2103_s6 = inlined_call_operand.vmem [shape: f32[1,32], index: 6, kind: input, shape index: {}]   ;;  %s2104_s7 = inlined_call_operand.vmem [shape: f32[32,16], index: 7, kind: input, shape index: {}]   ;;  %s2105_s8 = inlined_call_operand.vmem [shape: f32[1,16], index: 8, kind: input, shape index: {}]   ;;  %s2106_s9 = inlined_call_operand.vmem [shape: f32[16,8], index: 9, kind: input, shape index: {}]   ;;  %s2107_s10 = inlined_call_operand.vmem [shape: f32[1,8], index: 10, kind: input, shape index: {}]   ;;  %s2108_s11 = inlined_call_operand.vmem [shape: f32[8,2], index: 11, kind: input, shape index: {}]   ;;  %s2109_s12 = inlined_call_operand.vmem [shape: f32[1,2], index: 12, kind: input, shape index: {}]   ;;  %s2110_s13 = inlined_call_operand.vmem [shape: f32[2,5,6], index: 13, kind: input, shape index: {}]   ;;  %s2111_s14 = inlined_call_operand.vmem [shape: f32[1,6], index: 14, kind: input, shape index: {}]   ;;  %s2112_s15 = inlined_call_operand.hbm [shape: f32[2,1,6], index: 15, kind: output, shape index: {}]  }
   0x1   :  { %2120 = sst [smem:[#allocation11_spill]] %s2097_s0 }
   0x2   :  { %20 = vsyncpa [#allocation3], 0 }
   0x3   :  { %22 = vsyncpa [#allocation3 + $0x1], 0  ;;  %s1701_s18 = smov 0   ;;  %s1703_s19 = smov 0  }
   0x4   :  { %s1705_s20 = smov 0   ;;  %s1707_s21 = smov 0  }
   0x5 LB: > { %2121 = sst [smem:[#allocation5_spill]] %s1598_s18  ;;  %s1722_s22 = sadd.s32 4294967295, %s1610_s21   ;;  %s1610_s21 = sphi %s1707_s21, %s2134_s21   ;;  %s1606_s20 = sphi %s1705_s20, %s2139_s20   ;;  %s1602_s19 = sphi %s1703_s19, %s2138_s19   ;;  %s1598_s18 = sphi %s1701_s18, %s2137_s18  }
   0x6   : > { %2122 = sst [smem:[#allocation6_spill]] %s1606_s20  ;;  %s1256_s23 = sadd.s32 4294967294, %s1610_s21  }
   0x7   : > { %2123 = sst [smem:[#allocation7_spill]] %s1610_s21  ;;  %s1726_s24 = sadd.s32 1, %s1610_s21  }
   0x8   : > { %2124 = sst [smem:[#allocation8_spill]] %s1726_s24  ;;  %s355_s25 = sadd.s32 1, %s1606_s20 }
   0x9   : > { %s352_s26 = ssub.s32 %s1610_s21, %s1726_s24  ;;  %p365_p0 = scmp.ne.s32.totalorder %s1606_s20, %s1602_s19 }
   0xa   : > { %p353_p1 = scmp.eq.s32.totalorder %s352_s26, 0  ;;  %p366_p2 = scmp.eq.s32.totalorder %s1722_s22, 1 }
   0xb   : > { %p371_p3 = scmp.ne.s32.totalorder %s1602_s19, %s1598_s18  ;;  %p372_p4 = scmp.eq.s32.totalorder %s1256_s23, 1 }
   0xc   : > { %s1737_s27 = scalar_select %p353_p1, %s1606_s20, %s355_s25  }
   0xd   : > { %p1739_p5 = por %p366_p2, %p365_p0  ;;  %p1743_p6 = por %p372_p4, %p371_p3 }
   0xe   : > { %2125 = sst [smem:[#allocation9_spill]] %s1737_s27  ;;  %p1259_p7 = scmp.ge.s32.totalorder %s1610_s21, 1 }
   0xf   : > { %s2127_s29 = scalar_select %p1743_p6, 1, 0 }
  0x10   : > { %p440_p8 = scmp.lt.s32.totalorder %s1610_s21, 3 }
  0x11   : > { %2128 = sst [smem:[#allocation10_spill]] %s2127_s29 }
  0x12   : > { %p441_p9 = pnand %p1259_p7, %p440_p8 }
  0x13   : > { %p487_p10 = scmp.lt.s32.totalorder (!%p441_p9), %s1722_s22, 1  ;;  %v517_v0 = vld [vmem:[%s2098_s1 + $0x80] sm:$0xff] (!%p441_p9)  ;;  %v518_v1 = vld [vmem:[%s2098_s1 + $0x88] sm:$0xff] (!%p441_p9)  ;;  %v519_v5 = vld [vmem:[%s2098_s1 + $0x90] sm:$0xff] (!%p441_p9)  ;;  %v1612_v7 = vmov (!%p441_p9), 0.0|0.0   ;;  %vm1613_vm0 = vmmov (!%p441_p9), 0  }
  0x14   : > { %444 = sbr.rel (%p441_p9) target bundleno = 1960 (0x7a8), region = 80  ;;  %v501_v2 = vld [vmem:[%s2098_s1] sm:$0xff] (!%p441_p9)  ;;  %v1403_v3 = vpack.c.bf16 (!%p441_p9), %v518_v1, %v517_v0  ;;  %v502_v4 = vld [vmem:[%s2098_s1 + $0x8] sm:$0xff] (!%p441_p9)  ;;  %v520_v6 = vld [vmem:[%s2098_s1 + $0x98] sm:$0xff] (!%p441_p9)  ;;  %1435 = vmatprep.subr.bf16.mxu1 (!%p441_p9), %v1612_v7  ;;  %v1614_v13 = vmov (!%p441_p9), 0.0   ;;  %s2129_s0 = sld [smem:[#allocation11_spill]] (!%p441_p9) }
  0x15   : > { %v1405_v8 = vpack.c.bf16 (!%p441_p9), %v502_v4, %v501_v2  ;;  %v1407_v9 = vpack.c.bf16 (!%p441_p9), %v520_v6, %v519_v5  ;;  %v503_v10 = vld [vmem:[%s2098_s1 + $0x10] sm:$0xff] (!%p441_p9)  ;;  %v504_v11 = vld [vmem:[%s2098_s1 + $0x18] sm:$0xff] (!%p441_p9)  ;;  %v521_v12 = vld [vmem:[%s2098_s1 + $0xa0] sm:$0xff] (!%p441_p9)  ;;  %1350 = vmatprep.mubr.msk.f32.mxu1 (!%p441_p9), %vm1613_vm0, %v1614_v13  ;;  %vm499_vm1 = vcmask (!%p441_p9), 1040384   ;;  %vm544_vm2 = vcmask (!%p441_p9), 261120   ;;  %s2130_s30 = smov (!%p441_p9), 32  }
  0x16   : > { %1404 = vmatprep.subr.bf16.mxu0 (!%p441_p9), %v1403_v3  ;;  %v522_v14 = vld [vmem:[%s2098_s1 + $0xa8] sm:$0xff] (!%p441_p9)  ;;  %v1409_v15 = vpack.c.bf16 (!%p441_p9), %v504_v11, %v503_v10  ;;  %v505_v17 = vld [vmem:[%s2098_s1 + $0x20] sm:$0xff] (!%p441_p9)  ;;  %v523_v20 = vld [vmem:[%s2098_s1 + $0xb0] sm:$0xff] (!%p441_p9)  ;;  %s1616_s29 = smov (!%p441_p9), 96   ;;  %vm806_vm3 = vcmask (!%p441_p9), 523264   ;;  %vm827_vm4 = vcmask (!%p441_p9), 785408  }
  0x17   : > { %1406 = vmatpush3.bf16.msra.mxu0 (!%p441_p9), %v1405_v8  ;;  %v1411_v16 = vpack.c.bf16 (!%p441_p9), %v522_v14, %v521_v12  ;;  %v506_v18 = vld [vmem:[%s2098_s1 + $0x28] sm:$0xff] (!%p441_p9)  ;;  %v524_v21 = vld [vmem:[%s2098_s1 + $0xb8] sm:$0xff] (!%p441_p9)  ;;  %v507_v25 = vld [vmem:[%s2098_s1 + $0x30] sm:$0xff] (!%p441_p9)  ;;  %vm996_vm5 = vcmask (!%p441_p9), 130048   ;;  %vm1079_vm6 = vcmask (!%p441_p9), 64512   ;;  %vm1162_vm7 = vcmask (!%p441_p9), 45056  }
  0x18   : > { %1408 = vmatprep.subr.bf16.mxu0 (!%p441_p9), %v1407_v9  ;;  %v1413_v23 = vpack.c.bf16 (!%p441_p9), %v506_v18, %v505_v17  ;;  %v1415_v24 = vpack.c.bf16 (!%p441_p9), %v524_v21, %v523_v20  ;;  %v508_v26 = vld [vmem:[%s2098_s1 + $0x38] sm:$0xff] (!%p441_p9)  ;;  %v525_v27 = vld [vmem:[%s2098_s1 + $0xc0] sm:$0xff] (!%p441_p9)  ;;  %v526_v28 = vld [vmem:[%s2098_s1 + $0xc8] sm:$0xff] (!%p441_p9)  ;;  %s485_s20 = sand.u32 (!%p441_p9), 1, %s1602_s19   ;;  %vm1186_vm8 = vcmask (!%p441_p9), 40960  }
  0x19   : > { %v533_v29 = vld [vmem:[%s2098_s1 + $0x100] sm:$0xff] (!%p441_p9)  ;;  %v534_v30 = vld [vmem:[%s2098_s1 + $0x108] sm:$0xff] (!%p441_p9)  ;;  %v1417_v31 = vpack.c.bf16 (!%p441_p9), %v508_v26, %v507_v25  ;;  %v535_v33 = vld [vmem:[%s2098_s1 + $0x110] sm:$0xff] (!%p441_p9)  ;;  %v1419_v35 = vpack.c.bf16 (!%p441_p9), %v526_v28, %v525_v27  ;;  %s1189_s25 = scalar_lea.sflag (!%p441_p9), [#allocation3], %s485_s20 }
  0x1a   : > { %v1436_v32 = vpack.c.bf16 (!%p441_p9), %v534_v30, %v533_v29  ;;  %v536_v34 = vld [vmem:[%s2098_s1 + $0x118] sm:$0xff] (!%p441_p9)  ;;  %v509_v36 = vld [vmem:[%s2098_s1 + $0x40] sm:$0xff] (!%p441_p9)  ;;  %v510_v37 = vld [vmem:[%s2098_s1 + $0x48] sm:$0xff] (!%p441_p9) }
  0x1b   : > { %s488_s16 = scalar_select %p487_p10, %s1722_s22, 1  ;;  %1410 = vmatpush3.bf16.msra.mxu0 %v1409_v15  ;;  %v527_v38 = vld [vmem:[%s2098_s1 + $0xd0] sm:$0xff]  ;;  %v528_v39 = vld [vmem:[%s2098_s1 + $0xd8] sm:$0xff]  ;;  %v1439_v40 = vpack.c.bf16 %v536_v34, %v535_v33  ;;  %v1421_v41 = vpack.c.bf16 %v510_v37, %v509_v36  ;;  %v529_v45 = vld [vmem:[%s2098_s1 + $0xe0] sm:$0xff] }
  0x1c   : > { %1412 = vmatprep.subr.bf16.mxu0 %v1411_v16  ;;  %1437 = vmatpush3.bf16.msra.mxu1 %v1436_v32  ;;  %v1423_v42 = vpack.c.bf16 %v528_v39, %v527_v38  ;;  %v511_v43 = vld [vmem:[%s2098_s1 + $0x50] sm:$0xff]  ;;  %v512_v44 = vld [vmem:[%s2098_s1 + $0x58] sm:$0xff]  ;;  %v530_v46 = vld [vmem:[%s2098_s1 + $0xe8] sm:$0xff] }
  0x1d   : > { %s1278_s26 = sshll.u32 %s488_s16, 4  ;;  %1438 = vmatprep.subr.bf16.mxu1 %v1612_v7  ;;  %v1425_v47 = vpack.c.bf16 %v512_v44, %v511_v43  ;;  %v1427_v48 = vpack.c.bf16 %v530_v46, %v529_v45  ;;  %v513_v49 = vld [vmem:[%s2098_s1 + $0x60] sm:$0xff]  ;;  %v514_v50 = vld [vmem:[%s2098_s1 + $0x68] sm:$0xff]  ;;  %v531_v51 = vld [vmem:[%s2098_s1 + $0xf0] sm:$0xff] }
  0x1e   : > { %s1787_s23 = scalar_lea.vmem %s2129_s0, %s1278_s26  ;;  %s2118_s26 = smov 32   ;;  %v532_v52 = vld [vmem:[%s2098_s1 + $0xf8] sm:$0xff]  ;;  %v1429_v53 = vpack.c.bf16 %v514_v50, %v513_v49  ;;  %v515_v55 = vld [vmem:[%s2098_s1 + $0x70] sm:$0xff]  ;;  %v695_v61 = vld [vmem:[%s2100_s3] sm:$0xff] }
  0x1f   : > { %v493_v19 = vld [vmem:[%s1787_s23 + $0x8] sm:$0x1f]  ;;  %1414 = vmatpush3.bf16.msra.mxu0 %v1413_v23  ;;  %v1431_v54 = vpack.c.bf16 %v532_v52, %v531_v51  ;;  %v516_v56 = vld [vmem:[%s2098_s1 + $0x78] sm:$0xff]  ;;  %v492_v58 = vld [vmem:[%s1787_s23] sm:$0x1f] }
  0x20   : > { %v495_v22 = vrot.slane %v493_v19, 7  ;;  %612 = vmatprep.mubr.f32.mxu0 %v493_v19  ;;  %1416 = vmatprep.subr.bf16.mxu0 %v1415_v24  ;;  %v1433_v57 = vpack.c.bf16 %v516_v56, %v515_v55  ;;  %v696_v62 = vld [vmem:[%s2100_s3 + $0x8] sm:$0xff]  ;;  %v697_v63 = vld [vmem:[%s2100_s3 + $0x10] sm:$0xff]  ;;  %v698_v1 = vld [vmem:[%s2100_s3 + $0x18] sm:$0xff] }
  0x21   : > { %1440 = vmatpush3.bf16.msra.mxu1 %v1439_v40  ;;  %v1442_v0 = vpack.c.bf16 %v696_v62, %v695_v61  ;;  %v1445_v2 = vpack.c.bf16 %v698_v1, %v697_v63  ;;  %v699_v3 = vld [vmem:[%s2100_s3 + $0x20] sm:$0xff]  ;;  %v700_v4 = vld [vmem:[%s2100_s3 + $0x28] sm:$0xff]  ;;  %v701_v6 = vld [vmem:[%s2100_s3 + $0x30] sm:$0xff] }
  0x22   : > { %496 = vrot.lane.b32.xlu0 %v495_v22, %s2118_s26  ;;  %1441 = vmatprep.subr.bf16.mxu1 %v1612_v7  ;;  %v1448_v5 = vpack.c.bf16 %v700_v4, %v699_v3  ;;  %v702_v8 = vld [vmem:[%s2100_s3 + $0x38] sm:$0xff]  ;;  %v703_v10 = vld [vmem:[%s2100_s3 + $0x40] sm:$0xff]  ;;  %v704_v11 = vld [vmem:[%s2100_s3 + $0x48] sm:$0xff]  ;;  %s486_s26 = scalar_lea.vmem [#allocation2], %s485_s20 }
  0x23   : > { %1418 = vmatpush3.bf16.msra.mxu0 %v1417_v31  ;;  %v1451_v9 = vpack.c.bf16 %v702_v8, %v701_v6  ;;  %v1454_v12 = vpack.c.bf16 %v704_v11, %v703_v10  ;;  %v705_v14 = vld [vmem:[%s2100_s3 + $0x50] sm:$0xff]  ;;  %v706_v15 = vld [vmem:[%s2100_s3 + $0x58] sm:$0xff]  ;;  %v707_v17 = vld [vmem:[%s2100_s3 + $0x60] sm:$0xff]  ;;  %s1201_s16 = sshll.u32 %s486_s26, 4  ;;  %s2057_s16 = int_to_ptr.vmem [resolvable:$true] %s1201_s16 }
  0x24   : > { %1420 = vmatprep.subr.bf16.mxu0 %v1419_v35  ;;  %v1457_v16 = vpack.c.bf16 %v706_v15, %v705_v14  ;;  %v708_v18 = vld [vmem:[%s2100_s3 + $0x68] sm:$0xff]  ;;  %v709_v20 = vld [vmem:[%s2100_s3 + $0x70] sm:$0xff]  ;;  %v710_v21 = vld [vmem:[%s2100_s3 + $0x78] sm:$0xff] }
  0x25   : > { %v1460_v19 = vpack.c.bf16 %v708_v18, %v707_v17  ;;  %v1463_v22 = vpack.c.bf16 %v710_v21, %v709_v20  ;;  %v711_v23 = vld [vmem:[%s2100_s3 + $0x80] sm:$0xff]  ;;  %v712_v24 = vld [vmem:[%s2100_s3 + $0x88] sm:$0xff]  ;;  %v713_v28 = vld [vmem:[%s2100_s3 + $0x90] sm:$0xff] }
  0x26   : > { %v1466_v26 = vpack.c.bf16 %v712_v24, %v711_v23  ;;  %v714_v29 = vld [vmem:[%s2100_s3 + $0x98] sm:$0xff]  ;;  %v1262_v32 = vld [vmem:[%s2099_s2] ss:$0 sm:$0xff]  ;;  %v810_v43 = vld [vmem:[%s2102_s5 + $0x10] sm:$0xff] }
  0x27   : > { %1422 = vmatpush3.bf16.msra.mxu0 %v1421_v41  ;;  %v1469_v31 = vpack.c.bf16 %v714_v29, %v713_v28  ;;  %v808_v41 = vld [vmem:[%s2102_s5] sm:$0xff]  ;;  %v811_v45 = vld [vmem:[%s2102_s5 + $0x18] sm:$0xff]  ;;  %v813_v49 = vld [vmem:[%s2102_s5 + $0x28] sm:$0xff] }
  0x28   : > { %1424 = vmatprep.subr.bf16.mxu0 %v1423_v42  ;;  %v809_v42 = vld [vmem:[%s2102_s5 + $0x8] sm:$0xff]  ;;  %v1264_v46 = vld [vmem:[%s2101_s4] ss:$0 sm:$0xff]  ;;  %v814_v55 = vld [vmem:[%s2102_s5 + $0x30] sm:$0xff] }
  0x29   : > { %v1472_v44 = vpack.c.bf16 %v809_v42, %v808_v41  ;;  %v815_v56 = vld [vmem:[%s2102_s5 + $0x38] sm:$0xff]  ;;  %v818_v62 = vld [vmem:[%s2102_s5 + $0x50] sm:$0xff]  ;;  %v902_v1 = vld [vmem:[%s2104_s7] sm:$0xff] }
  0x2a   : > { %v819_v63 = vld [vmem:[%s2102_s5 + $0x58] sm:$0xff]  ;;  %v1266_v11 = vld [vmem:[%s2103_s6] ss:$0 sm:$0xff]  ;;  %v988_v18 = vld [vmem:[%s2106_s9 + $0x8] sm:$0xff] }
  0x2b   : > { %1426 = vmatpush3.bf16.msra.mxu0 %v1425_v47  ;;  %v1475_v47 = vpack.c.bf16 %v811_v45, %v810_v43  ;;  %v987_v17 = vld [vmem:[%s2106_s9] sm:$0xff] }
  0x2c   : > { %1428 = vmatprep.subr.bf16.mxu0 %v1427_v48  ;;  %v812_v48 = vld [vmem:[%s2102_s5 + $0x20] sm:$0xff] }
  0x2d   : > { %v1268_v20 = vld [vmem:[%s2105_s8] ss:$0 sm:$0xff] }
  0x2f   : > { %1430 = vmatpush3.bf16.msra.mxu0 %v1429_v53  ;;  %v1478_v53 = vpack.c.bf16 %v813_v49, %v812_v48 }
  0x30   : > { %1432 = vmatprep.subr.bf16.mxu0 %v1431_v54 }
  0x33   : > { %1434 = vmatpush3.bf16.msra.mxu0 %v1433_v57 }
  0x34   : > { %1471 = vmatprep.subr.bf16.mxu0 %v1612_v7 }
  0x36   : > { %613 = vmatmul.mubr.f32.vlgmr.msra.gmra.mrb[0].mxu0 %v492_v58  ;;  %v1481_v58 = vpack.c.bf16 %v815_v56, %v814_v55  ;;  %v1154_v55 = vld [vmem:[%s2111_s14] sm:$0x1] }
  0x37   : > { %1377 = vmatprep.mubr.msk.f32.mxu0 %vm1613_vm0, %v1614_v13  ;;  %1473 = vmatpush3.bf16.msra.mxu0 %v1472_v44 }
  0x38   : > { %1474 = vmatprep.subr.bf16.mxu0 %v1612_v7 }
  0x3b   : > { %1476 = vmatpush3.bf16.msra.mxu0 %v1475_v47 }
  0x3c   : > { %1477 = vmatprep.subr.bf16.mxu0 %v1612_v7 }
  0x3f   : > { %1479 = vmatpush3.bf16.msra.mxu0 %v1478_v53 }
  0x40   : > { %1480 = vmatprep.subr.bf16.mxu0 %v1612_v7 }
  0x43   : > { %1482 = vmatpush3.bf16.msra.mxu0 %v1481_v58 }
  0x44   : > { %1483 = vmatprep.subr.bf16.mxu0 %v1612_v7 }
  0x94   : > { %v497_v59 = vpop.permute.xlu0 %496 }
  0x95   : > { %v500_v60 = vsel %vm499_vm1, 0.0, %v497_v59  ;;  %v816_v59 = vld [vmem:[%s2102_s5 + $0x40] sm:$0xff] }
  0x96   : > { %1351 = vmatmul.mubr.msk.f32.vlgmr.msra.gmra.mrb[0].mxu1 %vm544_vm2, %v500_v60  ;;  %v817_v60 = vld [vmem:[%s2102_s5 + $0x48] sm:$0xff] }
  0x97   : > { %1443 = vmatpush1.bf16.msra.mxu1 %v1442_v0  ;;  %v1484_v61 = vpack.c.bf16 %v817_v60, %v816_v59  ;;  %v1487_v0 = vpack.c.bf16 %v819_v63, %v818_v62 }
  0x98   : > { %1444 = vmatprep.subr.bf16.mxu1 %v1612_v7 }
  0x99   : > { %1485 = vmatpush3.bf16.msra.mxu0 %v1484_v61 }
  0x9a   : > { %1486 = vmatprep.subr.bf16.mxu0 %v1612_v7 }
  0x9b   : > { %1446 = vmatpush1.bf16.msra.mxu1 %v1445_v2  ;;  %v903_v2 = vld [vmem:[%s2104_s7 + $0x8] sm:$0xff] }
  0x9c   : > { %1447 = vmatprep.subr.bf16.mxu1 %v1612_v7  ;;  %v1490_v3 = vpack.c.bf16 %v903_v2, %v902_v1 }
  0x9d   : > { %1488 = vmatpush3.bf16.msra.mxu0 %v1487_v0 }
  0x9e   : > { %1495 = vmatprep.subr.bf16.mxu0 %v1612_v7 }
  0x9f   : > { %1449 = vmatpush1.bf16.msra.mxu1 %v1448_v5 }
  0xa0   : > { %1450 = vmatprep.subr.bf16.mxu1 %v1612_v7 }
  0xa3   : > { %1452 = vmatpush1.bf16.msra.mxu1 %v1451_v9  ;;  %v904_v9 = vld [vmem:[%s2104_s7 + $0x10] sm:$0xff] }
  0xa4   : > { %1453 = vmatprep.subr.bf16.mxu1 %v1612_v7 }
  0xa7   : > { %1455 = vmatpush1.bf16.msra.mxu1 %v1454_v12 }
  0xa8   : > { %1456 = vmatprep.subr.bf16.mxu1 %v1612_v7 }
  0xab   : > { %1458 = vmatpush1.bf16.msra.mxu1 %v1457_v16 }
  0xac   : > { %1459 = vmatprep.subr.bf16.mxu1 %v1612_v7 }
  0xaf   : > { %1461 = vmatpush1.bf16.msra.mxu1 %v1460_v19  ;;  %v1496_v19 = vpack.c.bf16 %v988_v18, %v987_v17 }
  0xb0   : > { %1462 = vmatprep.subr.bf16.mxu1 %v1612_v7 }
  0xb3   : > { %1464 = vmatpush1.bf16.msra.mxu1 %v1463_v22 }
  0xb4   : > { %1465 = vmatprep.subr.bf16.mxu1 %v1612_v7 }
  0xb7   : > { %1467 = vmatpush1.bf16.msra.mxu1 %v1466_v26 }
  0xb8   : > { %1468 = vmatprep.subr.bf16.mxu1 %v1612_v7 }
  0xbb   : > { %1470 = vmatpush1.bf16.msra.mxu1 %v1469_v31  ;;  %v1619_v31 = vmov 0  }
  0xbc   : > { %1489 = vmatprep.subr.bf16.mxu1 %v1612_v7  ;;  %1545 = vset.pattern.permute.xlu0 %v1619_v31 }
 0x109   : > { %v1311_v25 = vpop.f32.mrb[0].mxu0 }
 0x10a   : > { %v1312_v27 = vpop.f32.mrb[1].mxu0 }
 0x10b   : > { %v1313_v30 = vadd.f32 %v1312_v27, %v1311_v25  ;;  %v1270_v25 = vld [vmem:[%s2107_s10] ss:$0 sm:$0xff] }
 0x10d   : > { %v615_v33 = vadd.f32 %v1313_v30, %v1262_v32  ;;  %v1618_v30 = vmov 1   ;;  %v1272_v32 = vld [vmem:[%s2109_s12] ss:$0 sm:$0xff] }
 0x10e   : > { %1546 = vset.pattern.permute.xlu1 %v1618_v30 }
 0x169   : > { %v684_v34 = vpop.f32.mrb[0].mxu1 }
 0x16a   : > { %v685_v35 = vadd.f32 %v684_v34, %v615_v33  ;;  %v1352_v36 = vpop.f32.mrb[1].mxu1 }
 0x16c   : > { %v688_v37 = vmax.f32 %v685_v35, 0.0 }
 0x16e   : > { %v690_v38 = vrot.slane %v688_v37, 7 }
 0x170   : > { %691 = vrot.lane.b32.xlu0 %v690_v38, %s2130_s30  ;;  %v1155_v38 = vld [vmem:[%s2110_s13] sm:$0x1f]  ;;  %s1548_s30 = scalar_lea.vmem %s2057_s16, 16 }
 0x171   : > { %p1549_p11 = scmp.ne.s32.totalorder %s2057_s16, %s1548_s30 }
 0x173   : > { %p1550_p12 = pnand %p1549_p11, %p1739_p5 }
 0x175   : > { %p1551_p13 = pneg %p1550_p12 }
 0x1e2   : > { %v692_v39 = vpop.permute.xlu0 %691 }
 0x1e3   : > { %v694_v40 = vsel %vm499_vm1, 0.0, %v692_v39 }
 0x1e4   : > { %1265 = vmatprep.mubr.msk.f32.mxu1 %vm544_vm2, %v694_v40 }
 0x1e5   : > { %790 = vmatmul.mubr.f32.vlgmr.msra.gmra.mrb[2].mxu1 %v688_v37  ;;  %v1274_v37 = vld [vmem:[%s2110_s13 + $0x8] sm:$0x1f] }
 0x1e6   : > { %1388 = vmatprep.mubr.msk.f32.mxu1 %vm1613_vm0, %v1614_v13  ;;  %1491 = vmatpush3.bf16.msra.mxu1 %v1490_v3 }
 0x1e7   : > { %1492 = vmatprep.subr.bf16.mxu1 %v1612_v7  ;;  %v905_v7 = vld [vmem:[%s2104_s7 + $0x18] sm:$0xff] }
 0x1e8   : > { %v1493_v10 = vpack.c.bf16 %v905_v7, %v904_v9 }
 0x1ea   : > { %1494 = vmatpush3.bf16.msra.mxu1 %v1493_v10 }
 0x1eb   : > { %1398 = vmatprep.subr.mxu1 %v1614_v13 }
 0x2b8   : > { %v791_v50 = vpop.f32.mrb[2].mxu1 }
 0x2b9   : > { %v792_v51 = vadd.f32 %v1264_v46, %v791_v50  ;;  %v793_v52 = vpop.f32.mrb[3].mxu1 }
 0x2bb   : > { %v795_v54 = vmax.f32 %v792_v51, 0.0 }
 0x2bd   : > { %v797_v57 = vrot.slane %v795_v54, 7 }
 0x2bf   : > { %798 = vrot.lane.b32.xlu1 %v797_v57, %s1616_s29  ;;  %s1617_s29 = smov 64  }
 0x331   : > { %v799_v4 = vpop.permute.xlu1 %798 }
 0x332   : > { %v801_v5 = vsel %vm499_vm1, 0.0, %v799_v4 }
 0x333   : > { %803 = vrot.lane.b32.xlu1 %v801_v5, %s1617_s29  ;;  %s1275_s29 = sshll.u32 %s1722_s22, 4  ;;  %s1620_s22 = smov [#allocation2]  }
 0x334   : > { %s2055_s18 = scalar_lea.hbm %s2112_s15, %s1275_s29  ;;  %s1552_s23 = sshll.u32 %s1620_s22, 4  ;;  %s1553_s23 = int_to_ptr.vmem [resolvable:$false] %s1552_s23 }
 0x335   : > { %s1554_s17 = scalar_lea.vmem %s1553_s23, 32  ;;  %p1555_p0 = scmp.lt.s32.totalorder %s2057_s16, %s1553_s23 }
 0x336   : > { %p1556_p1 = scmp.lt.s32.totalorder %s1554_s17, %s1548_s30 }
 0x338   : > { %p1557_p2 = por %p1556_p1, %p1555_p0 }
 0x33a   : > { %p1558_p3 = pnand %p1557_p2, %p1551_p13 }
 0x3a5   : > { %v804_v6 = vpop.permute.xlu1 %803 }
 0x3a6   : > { %v807_v8 = vsel %vm806_vm3, %v795_v54, %v804_v6 }
 0x3a7   : > { %1378 = vmatmul.mubr.msk.f32.vlgmr.msra.gmra.mrb[2].mxu0 %vm827_vm4, %v807_v8 }
 0x3a8   : > { %1395 = vmatprep.mubr.msk.f32.mxu0 %vm1613_vm0, %v1614_v13  ;;  %1497 = vmatpush3.bf16.msra.mxu0 %v1496_v19 }
 0x47a   : > { %v897_v12 = vpop.f32.mrb[2].mxu0 }
 0x47b   : > { %v898_v14 = vadd.f32 %v1266_v11, %v897_v12  ;;  %v1379_v15 = vpop.f32.mrb[3].mxu0 }
 0x47d   : > { %v901_v16 = vmax.f32 %v898_v14, 0.0 }
 0x47f   : > { %1389 = vmatmul.mubr.msk.f32.vlgmr.msra.gmra.mrb[4].mxu1 %vm544_vm2, %v901_v16 }
 0x480   : > { %1400 = vmatprep.mubr.msk.f32.mxu1 %vm1613_vm0, %v1614_v13  ;;  %v1071_v13 = vld [vmem:[%s2108_s11] sm:$0xff] }
 0x481   : > { %1399 = vmatpush3.msra.mxu1 %v1071_v13 }
 0x552   : > { %v982_v21 = vpop.f32.mrb[4].mxu1 }
 0x553   : > { %v983_v22 = vadd.f32 %v1268_v20, %v982_v21  ;;  %v1390_v23 = vpop.f32.mrb[5].mxu1 }
 0x555   : > { %v986_v24 = vmax.f32 %v983_v22, 0.0 }
 0x557   : > { %1396 = vmatmul.mubr.msk.f32.vlgmr.msra.gmra.mrb[4].mxu0 %vm996_vm5, %v986_v24 }
 0x62a   : > { %v1066_v26 = vpop.f32.mrb[4].mxu0 }
 0x62b   : > { %v1067_v27 = vadd.f32 %v1270_v25, %v1066_v26  ;;  %v1397_v28 = vpop.f32.mrb[5].mxu0 }
 0x62d   : > { %v1070_v29 = vmax.f32 %v1067_v27, 0.0 }
 0x62f   : > { %1401 = vmatmul.mubr.msk.f32.vlgmr.msra.gmra.mrb[6].mxu1 %vm1079_vm6, %v1070_v29 }
 0x702   : > { %v1149_v33 = vpop.f32.mrb[6].mxu1 }
 0x703   : > { %v1150_v34 = vadd.f32 %v1272_v32, %v1149_v33  ;;  %v1402_v35 = vpop.f32.mrb[7].mxu1 }
 0x705   : > { %v1153_v36 = vmax.f32 %v1150_v34, 0.0 }
 0x707   : > { %1174 = vperm.xlu1 %1546, %v1153_v36   ;;  %1158 = vperm.xlu0 %1545, %v1153_v36  }
 0x70b   : > { %1547 = vset.pattern.permute.xlu0 %v1618_v30 }
 0x786   : > { %v1175_v39 = vpop.permute.xlu1 %1174  ;;  %v1159_v40 = vpop.permute.xlu0 %1158 }
 0x787   : > { %v1177_v41 = vmul.f32 %v1274_v37, %v1175_v39  ;;  %v1161_v42 = vmul.f32 %v1159_v40, %v1155_v38 }
 0x789   : > { %v1178_v43 = vsel %vm1162_vm7, %v1177_v41, 0.0  ;;  %v1163_v44 = vsel %vm1162_vm7, %v1161_v42, 0.0 }
 0x78a   : > { %v1179_v45 = vrot.slane %v1178_v43, 4  ;;  %v1164_v46 = vrot.slane %v1163_v44, 4 }
 0x78c   : > { %v1180_v47 = vadd.f32 %v1179_v45, %v1178_v43  ;;  %v1165_v48 = vadd.f32 %v1164_v46, %v1163_v44 }
 0x78e   : > { %v1181_v49 = vrot.slane %v1180_v47, 2  ;;  %v1166_v50 = vrot.slane %v1165_v48, 2 }
 0x790   : > { %v1182_v51 = vadd.f32 %v1181_v49, %v1180_v47  ;;  %v1167_v52 = vadd.f32 %v1166_v50, %v1165_v48 }
 0x792   : > { %v1183_v53 = vrot.slane %v1182_v51, 1  ;;  %v1168_v54 = vrot.slane %v1167_v52, 1 }
 0x794   : > { %v1169_v56 = vadd.f32 %v1168_v54, %v1167_v52  ;;  %v1184_v57 = vadd.f32 %v1183_v53, %v1182_v51 }
 0x796   : > { %v1170_v58 = vadd.f32 %v1169_v56, %v1154_v55 }
 0x798   : > { %v1185_v59 = vadd.f32 %v1184_v57, %v1170_v58 }
 0x79a   : > { %1187 = vst.msk [vmem:[%s486_s26] sm:$0x1] %vm1186_vm8, %v1185_v59 }
 0x79b   : > { %1561 = shalt.err (!%p1558_p3)
}
 0x79c   : > { %s1562_s20 = scalar_lea.hbm %s2055_s18, 16  ;;  %s1566_s29 = scalar_lea.hbm %s2112_s15, 32 }
 0x79d   : > { %p1563_p4 = scmp.ne.s32.totalorder %s2055_s18, %s1562_s20  ;;  %p1567_p9 = scmp.lt.u32.totalorder %s2055_s18, %s2112_s15 }
 0x79e   : > { %p1568_p10 = scmp.lt.u32.totalorder %s1566_s29, %s1562_s20  ;;  %p1570_p12 = scmp.lt.u32.totalorder %s1562_s20, %s2055_s18 }
 0x79f   : > { %p1564_p7 = pnand %p1563_p4, %p1739_p5 }
 0x7a0   : > { %p1569_p11 = por %p1568_p10, %p1567_p9 }
 0x7a1   : > { %p1565_p8 = pneg %p1564_p7 }
 0x7a2   : > { %p1571_p13 = por %p1570_p12, %p1569_p11 }
 0x7a4   : > { %p1572_p0 = pnand %p1571_p13, %p1565_p8 }
 0x7a6   : > { %1575 = shalt.err (!%p1572_p0)
}
 0x7a7   : > { %1498 = dma.vmem_to_hbm [thread:$0]  (%p1739_p5), %s2057_s16, 16, %s2055_s18, %s1189_s25  }
 0x7a8 PF: > { %s2131_s21 = sld [smem:[#allocation7_spill]]  ;;  %s2132_s30 = sld [smem:[#allocation5_spill]] }
 0x7ae   : > { %p1504_p1 = scmp.ge.s32.totalorder %s2131_s21, 2  ;;  %s1213_s23 = sand.u32 1, %s2132_s30  }
 0x7af   : > { %s1214_s17 = scalar_lea.sflag [#allocation3], %s1213_s23 }
 0x7b0   : > { %p1501_p2 = pnand %p1504_p1, %p1743_p6 }
 0x7b2   : > { %1593 = dma.done.wait (!%p1501_p2), %s1214_s17, 16  }
 0x7b3   : > { %1595 = vsyncadd (!%p1501_p2), %s1214_s17, 4294967280  ;;  %s2134_s21 = sld [smem:[#allocation8_spill]]  ;;  %s2135_s20 = sld [smem:[#allocation6_spill]] }
 0x7b4   : > { %s2136_s27 = sld [smem:[#allocation9_spill]]  ;;  %s2137_s18 = smov %s1602_s19 }
 0x7b9   : > { %p25_p3 = scmp.ge.s32.totalorder %s2134_s21, 4   ;;  %s2138_s19 = smov %s2135_s20 }
 0x7ba   : > { %s2139_s20 = smov %s2136_s27 }
 0x7bb   :  { %27 = sbr.rel (!%p25_p3) target bundleno = 5 (0x5), region = 116 }
 0x7c2   :  { %1218 = vsyncpa [#allocation3], 1 }
 0x7c3   :  { %1220 = vsyncpa [#allocation3 + $0x1], 1 }

</bundles_post_ra>
